<compile_context>
chip_gen: v6e
topology: v6e:2x2x1
jax: 0.10.0
libtpu: 0.0.40
codegen_flags: <defaults>
</compile_context>

<pallas_src>
import numpy as np
import jax
import jax.numpy as jnp
from jax.experimental import pallas as pl
from jax.experimental.pallas import tpu as pltpu


def _trilinear_kernel(x1_ref, x2_ref, w_ref, out_ref, lhs_ref, bx_ref):
    f32 = jnp.float32
    j = pl.program_id(2)

    w = w_ref[...].astype(f32)            # (3, D): [w_dot, w_x, w_y]
    wdot = w[0][None, None, :]            # (1, 1, D)
    wx = w[1][None, None, :]
    wy = w[2][None, None, :]

    # Everything that depends only on (b, i): compute once per L1 tile and cache.
    @pl.when(j == 0)
    def _():
        x1f = x1_ref[...].astype(f32)                                 # (BB, TL1, D)
        s = jnp.sum(x1f * wdot, axis=-1, keepdims=True)               # (BB, TL1, 1)
        bx_ref[...] = jnp.sum(x1f * wx, axis=-1, keepdims=True)       # (BB, TL1, 1)
        lhs_ref[...] = (x1f * s).astype(lhs_ref.dtype)                # (BB, TL1, D)

    x2 = x2_ref[...]                                                  # (BB, TL2, D)
    # x2-side bias: VPU multiply + lane reduce, added in f32 after the matmul.
    by = jnp.sum(x2.astype(f32) * wy, axis=-1)                        # (BB, TL2)

    scores = jnp.einsum("bld,bmd->blm", lhs_ref[...], x2,
                        preferred_element_type=f32)                   # (BB, TL1, TL2)
    out_ref[...] = (scores + bx_ref[...] + by[:, None, :]).astype(out_ref.dtype)


def _round_up(x, m):
    return ((x + m - 1) // m) * m


def _vmem_capacity_bytes(default=64 * 1024 * 1024):
    try:
        info = pltpu.get_tpu_info()
        for name in ("vmem_capacity_bytes", "vmem_size_bytes", "vmem_bytes"):
            v = getattr(info, name, None)
            if v:
                return int(v)
    except Exception:
        pass
    return default


def trilinear(x1, x2, w_x, w_dot, w_y, out_dtype=None):
    """Pallas equivalent of Trilinear.forward.

    x1: [B, L1, D], x2: [B, L2, D], weights: [1, D] (or [D]) -> scores [B, L1, L2].
    """
    B, L1, D = x1.shape
    B2, L2, D2 = x2.shape
    assert B == B2 and D == D2, "batch / hidden dims must match"
    if x2.dtype != x1.dtype:
        x2 = x2.astype(x1.dtype)

    # Tiny weights stay in f32 (no wrapper-side rounding), packed into one (3, D) ref.
    w = jnp.concatenate(
        [jnp.reshape(w_dot, (1, D)), jnp.reshape(w_x, (1, D)), jnp.reshape(w_y, (1, D))],
        axis=0,
    ).astype(jnp.float32)

    out_dtype = jnp.dtype(x1.dtype if out_dtype is None else out_dtype)
    in_itemsize = jnp.dtype(x1.dtype).itemsize
    out_itemsize = out_dtype.itemsize

    # ---- generation-aware VMEM sizing (v5e/v6e: 128 MiB, v7x: 64 MiB per TC) ----
    vmem_cap = _vmem_capacity_bytes()
    budget = max(16 * 1024 * 1024, int(vmem_cap * 0.55))
    vmem_limit = min(int(vmem_cap * 0.80), 128 * 1024 * 1024)

    def footprint(bb, t1, t2):
        # Conservative per-step VMEM estimate using (8, 128)-padded extents:
        # double-buffered I/O blocks + persistent scratch + transient f32 intermediates.
        t1p = _round_up(t1, 8)
        t2_lane = _round_up(t2, 128)   # t2 as the lane (last) dim of the output block
        t2_sub = _round_up(t2, 8)      # t2 as the sublane dim of the x2 block
        dp = _round_up(D, 128)
        blocks = (2 * bb * (t1p + t2_sub) * dp * in_itemsize
                  + 2 * bb * t1p * t2_lane * out_itemsize
                  + 2 * 8 * dp * 4)
        scratch = bb * t1p * dp * in_itemsize + bb * t1p * 128 * 4
        interm = bb * t1p * t2_lane * 4 + bb * (t1p + t2_sub) * dp * 4
        return blocks + scratch + interm

    # ---- tile selection ----
    if footprint(1, L1, L2) <= budget:
        # Whole per-batch problem in one block: full-dim blocks are always legal, so no
        # padding and no output slice (removes the extra HBM passes flagged in review).
        TL1, TL2 = L1, L2
        L1p, L2p = L1, L2
        # Batch-blocking over divisors of B (no batch padding) to amortize step overhead.
        BB = 1
        for bb in range(min(B, 512), 0, -1):
            if B % bb == 0 and footprint(bb, L1, L2) <= budget:
                BB = bb
                break
    else:
        BB = 1
        L1p = _round_up(L1, 8)
        L2p = _round_up(L2, 128)
        t1_opts = [d for d in range(8, L1p + 1, 8) if L1p % d == 0]
        t2_opts = [d for d in range(128, L2p + 1, 128) if L2p % d == 0]
        TL1 = max(d for d in t1_opts if d <= 1024)     # big TL1 -> fewer x2 re-reads
        TL2 = max(d for d in t2_opts if d <= 2048)     # lane-dense, wide output stores
        # Shrink to the VMEM budget, preferring to keep TL1 large.
        while footprint(1, TL1, TL2) > budget and (TL1 > t1_opts[0] or TL2 > t2_opts[0]):
            if TL2 > t2_opts[0] and (TL2 >= TL1 or TL1 == t1_opts[0]):
                TL2 = max(d for d in t2_opts if d < TL2)
            else:
                TL1 = max(d for d in t1_opts if d < TL1)

    if L1p != L1:
        x1 = jnp.pad(x1, ((0, 0), (0, L1p - L1), (0, 0)))
    if L2p != L2:
        x2 = jnp.pad(x2, ((0, 0), (0, L2p - L2), (0, 0)))

    grid = (B // BB, L1p // TL1, L2p // TL2)
    n_i = L1p // TL1   # how many times x2 is re-read from HBM

    cost = pl.CostEstimate(
        flops=2 * B * L1p * L2p * D + 6 * B * (L1p + L2p) * D,
        transcendentals=0,
        bytes_accessed=(B * L1p * D + n_i * B * L2p * D + 3 * D) * in_itemsize
        + B * L1p * L2p * out_itemsize,
    )

    out = pl.pallas_call(
        _trilinear_kernel,
        out_shape=jax.ShapeDtypeStruct((B, L1p, L2p), out_dtype),
        grid_spec=pltpu.PrefetchScalarGridSpec(
            num_scalar_prefetch=0,
            grid=grid,
            in_specs=[
                pl.BlockSpec((BB, TL1, D), lambda b, i, j: (b, i, 0)),
                pl.BlockSpec((BB, TL2, D), lambda b, i, j: (b, j, 0)),
                pl.BlockSpec((3, D), lambda b, i, j: (0, 0)),
            ],
            out_specs=pl.BlockSpec((BB, TL1, TL2), lambda b, i, j: (b, i, j)),
            scratch_shapes=[
                pltpu.VMEM((BB, TL1, D), x1.dtype),      # cached LHS (x1 * s)
                pltpu.VMEM((BB, TL1, 1), jnp.float32),   # cached x1 bias
            ],
        ),
        compiler_params=pltpu.CompilerParams(
            dimension_semantics=("parallel", "parallel", "arbitrary"),
            vmem_limit_bytes=vmem_limit,
        ),
        cost_estimate=cost,
    )(x1, x2, w)

    if (L1p, L2p) != (L1, L2):
        out = out[:, :L1, :L2]
    return out


if __name__ == "__main__":
    # Small shapes consistent with the module: batch=2, seq=8, hidden=32.
    B, L1, L2, D = 2, 8, 8, 32
    key = jax.random.PRNGKey(0)
    k1, k2, k3, k4, k5 = jax.random.split(key, 5)
    x1 = jax.random.normal(k1, (B, L1, D), dtype=jnp.float32)
    x2 = jax.random.normal(k2, (B, L2, D), dtype=jnp.float32)

    # nn.Linear(D, 1, bias=False).weight has shape (1, D); xavier_uniform-style init.
    bound = float(np.sqrt(6.0 / (D + 1)))
    w_x = jax.random.uniform(k3, (1, D), jnp.float32, -bound, bound)
    w_dot = jax.random.uniform(k4, (1, D), jnp.float32, -bound, bound)
    w_y = jax.random.uniform(k5, (1, D), jnp.float32, -bound, bound)

    scores = trilinear(x1, x2, w_x, w_dot, w_y)
    jax.block_until_ready(scores)
    assert scores.shape == (B, L1, L2)

    # Pure-JAX reference mirroring the PyTorch forward exactly.
    s = jnp.einsum("bld,d->bl", x1, w_dot[0])[:, :, None]
    x1_logits = jnp.einsum("bld,d->bl", x1, w_x[0])[:, :, None]
    x2_logits = jnp.einsum("bmd,d->bm", x2, w_y[0])[:, None, :]
    ref = jnp.einsum("bld,bmd->blm", x1 * s, x2) + x1_logits + x2_logits

    np.testing.assert_allclose(np.asarray(scores), np.asarray(ref), rtol=1e-4, atol=1e-3)
    print("KERNEL_OK")
</pallas_src>

<mosaic_0001>
module attributes {stable_mosaic.version = 11 : i64} {
  func.func @_trilinear_kernel(%arg0: i32, %arg1: i32, %arg2: i32, %arg3: memref<2x8x32xf32, #tpu.memory_space<vmem>>, %arg4: memref<2x8x32xf32, #tpu.memory_space<vmem>>, %arg5: memref<3x32xf32, #tpu.memory_space<vmem>>, %arg6: memref<2x8x8xf32, #tpu.memory_space<vmem>>, %arg7: memref<2x8x32xf32, #tpu.memory_space<vmem>>, %arg8: memref<2x8x1xf32, #tpu.memory_space<vmem>>) attributes {dimension_semantics = [#tpu.dimension_semantics<parallel>, #tpu.dimension_semantics<parallel>, #tpu.dimension_semantics<arbitrary>], iteration_bounds = array<i64: 1, 1, 1>, scalar_prefetch = 0 : i64, scratch_operands = 2 : i64, tpu.core_type = #tpu.core_type<tc>, window_params = [{transform_indices = @transform_0, window_bounds = array<i64: 2, 8, 32>}, {transform_indices = @transform_1, window_bounds = array<i64: 2, 8, 32>}, {pipeline_mode = #tpu.pipeline_mode<synchronous>, transform_indices = @transform_2, window_bounds = array<i64: 3, 32>}, {transform_indices = @transform_3, window_bounds = array<i64: 2, 8, 8>}]} {
    %c0 = arith.constant 0 : index
    %c0_0 = arith.constant 0 : index
    %0 = vector.load %arg5[%c0, %c0_0] : memref<3x32xf32, #tpu.memory_space<vmem>>, vector<3x32xf32>
    %1 = vector.extract_strided_slice %0 {offsets = [0, 0], sizes = [1, 32], strides = [1, 1]} : vector<3x32xf32> to vector<1x32xf32>
    %2 = vector.shape_cast %1 : vector<1x32xf32> to vector<32xf32>
    %3 = vector.shape_cast %2 : vector<32xf32> to vector<1x1x32xf32>
    %4 = vector.extract_strided_slice %0 {offsets = [1, 0], sizes = [1, 32], strides = [1, 1]} : vector<3x32xf32> to vector<1x32xf32>
    %5 = vector.shape_cast %4 : vector<1x32xf32> to vector<32xf32>
    %6 = vector.shape_cast %5 : vector<32xf32> to vector<1x1x32xf32>
    %7 = vector.extract_strided_slice %0 {offsets = [2, 0], sizes = [1, 32], strides = [1, 1]} : vector<3x32xf32> to vector<1x32xf32>
    %8 = vector.shape_cast %7 : vector<1x32xf32> to vector<32xf32>
    %9 = vector.shape_cast %8 : vector<32xf32> to vector<1x1x32xf32>
    %c0_i32 = arith.constant 0 : i32
    %10 = arith.cmpi eq, %arg2, %c0_i32 : i32
    %11 = arith.extui %10 : i1 to i32
    %c0_i32_1 = arith.constant 0 : i32
    %12 = arith.cmpi ne, %11, %c0_i32_1 : i32
    scf.if %12 {
      %c0_15 = arith.constant 0 : index
      %c0_16 = arith.constant 0 : index
      %c0_17 = arith.constant 0 : index
      %26 = vector.load %arg3[%c0_15, %c0_16, %c0_17] : memref<2x8x32xf32, #tpu.memory_space<vmem>>, vector<2x8x32xf32>
      %27 = vector.broadcast %3 : vector<1x1x32xf32> to vector<2x8x32xf32>
      %28 = arith.mulf %26, %27 : vector<2x8x32xf32>
      %cst_18 = arith.constant dense<0.000000e+00> : vector<2x8xf32>
      %29 = vector.multi_reduction <add>, %28, %cst_18 [2] : vector<2x8x32xf32> to vector<2x8xf32>
      %30 = vector.shape_cast %29 : vector<2x8xf32> to vector<2x8x1xf32>
      %31 = vector.broadcast %6 : vector<1x1x32xf32> to vector<2x8x32xf32>
      %32 = arith.mulf %26, %31 : vector<2x8x32xf32>
      %cst_19 = arith.constant dense<0.000000e+00> : vector<2x8xf32>
      %33 = vector.multi_reduction <add>, %32, %cst_19 [2] : vector<2x8x32xf32> to vector<2x8xf32>
      %34 = vector.shape_cast %33 : vector<2x8xf32> to vector<2x8x1xf32>
      %c0_20 = arith.constant 0 : index
      %c0_21 = arith.constant 0 : index
      %c0_22 = arith.constant 0 : index
      %35 = vector.load %arg8[%c0_20, %c0_21, %c0_22] : memref<2x8x1xf32, #tpu.memory_space<vmem>>, vector<2x8x1xf32>
      tpu.vector_store %arg8[%c0_20, %c0_21, %c0_22], %34 {strides = array<i32>} : memref<2x8x1xf32, #tpu.memory_space<vmem>>, vector<2x8x1xf32>,
      %36 = vector.broadcast %30 : vector<2x8x1xf32> to vector<2x8x32xf32>
      %37 = arith.mulf %26, %36 : vector<2x8x32xf32>
      %c0_23 = arith.constant 0 : index
      %c0_24 = arith.constant 0 : index
      %c0_25 = arith.constant 0 : index
      %38 = vector.load %arg7[%c0_23, %c0_24, %c0_25] : memref<2x8x32xf32, #tpu.memory_space<vmem>>, vector<2x8x32xf32>
      tpu.vector_store %arg7[%c0_23, %c0_24, %c0_25], %37 {strides = array<i32>} : memref<2x8x32xf32, #tpu.memory_space<vmem>>, vector<2x8x32xf32>,
    } else {
    }
    %c0_2 = arith.constant 0 : index
    %c0_3 = arith.constant 0 : index
    %c0_4 = arith.constant 0 : index
    %13 = vector.load %arg4[%c0_2, %c0_3, %c0_4] : memref<2x8x32xf32, #tpu.memory_space<vmem>>, vector<2x8x32xf32>
    %14 = vector.broadcast %9 : vector<1x1x32xf32> to vector<2x8x32xf32>
    %15 = arith.mulf %13, %14 : vector<2x8x32xf32>
    %cst = arith.constant dense<0.000000e+00> : vector<2x8xf32>
    %16 = vector.multi_reduction <add>, %15, %cst [2] : vector<2x8x32xf32> to vector<2x8xf32>
    %c0_5 = arith.constant 0 : index
    %c0_6 = arith.constant 0 : index
    %c0_7 = arith.constant 0 : index
    %17 = vector.load %arg7[%c0_5, %c0_6, %c0_7] : memref<2x8x32xf32, #tpu.memory_space<vmem>>, vector<2x8x32xf32>
    "tpu.trace_start"() <{level = 10 : i32, message = "bld,bmd->blm"}> : () -> ()
    %cst_8 = arith.constant dense<0.000000e+00> : vector<2x8x8xf32>
    %18 = tpu.matmul %17, %13, %cst_8 {dimension_numbers = #tpu.dot_dimension_numbers<[2], [2], [1], [1], [0, 0, 0, 1, 1, 1], [0], [0]>} : vector<2x8x32xf32>, vector<2x8x32xf32>, vector<2x8x8xf32> -> vector<2x8x8xf32>
    "tpu.trace_stop"() : () -> ()
    %c0_9 = arith.constant 0 : index
    %c0_10 = arith.constant 0 : index
    %c0_11 = arith.constant 0 : index
    %19 = vector.load %arg8[%c0_9, %c0_10, %c0_11] : memref<2x8x1xf32, #tpu.memory_space<vmem>>, vector<2x8x1xf32>
    %20 = vector.broadcast %19 : vector<2x8x1xf32> to vector<2x8x8xf32>
    %21 = arith.addf %18, %20 : vector<2x8x8xf32>
    %22 = vector.shape_cast %16 : vector<2x8xf32> to vector<2x1x8xf32>
    %23 = vector.broadcast %22 : vector<2x1x8xf32> to vector<2x8x8xf32>
    %24 = arith.addf %21, %23 : vector<2x8x8xf32>
    %c0_12 = arith.constant 0 : index
    %c0_13 = arith.constant 0 : index
    %c0_14 = arith.constant 0 : index
    %25 = vector.load %arg6[%c0_12, %c0_13, %c0_14] : memref<2x8x8xf32, #tpu.memory_space<vmem>>, vector<2x8x8xf32>
    tpu.vector_store %arg6[%c0_12, %c0_13, %c0_14], %24 {strides = array<i32>} : memref<2x8x8xf32, #tpu.memory_space<vmem>>, vector<2x8x8xf32>,
    return
  }
  func.func @transform_0(%arg0: i32, %arg1: i32, %arg2: i32) -> (i32, i32, i32) {
    %c0_i32 = arith.constant 0 : i32
    %c0_i32_0 = arith.constant 0 : i32
    return %arg0, %arg1, %c0_i32 : i32, i32, i32
  }
  func.func @transform_1(%arg0: i32, %arg1: i32, %arg2: i32) -> (i32, i32, i32) {
    %c0_i32 = arith.constant 0 : i32
    %c0_i32_0 = arith.constant 0 : i32
    return %arg0, %arg2, %c0_i32 : i32, i32, i32
  }
  func.func @transform_2(%arg0: i32, %arg1: i32, %arg2: i32) -> (i32, i32) {
    %c0_i32 = arith.constant 0 : i32
    %c0_i32_0 = arith.constant 0 : i32
    %c0_i32_1 = arith.constant 0 : i32
    return %c0_i32, %c0_i32_0 : i32, i32
  }
  func.func @transform_3(%arg0: i32, %arg1: i32, %arg2: i32) -> (i32, i32, i32) {
    %c0_i32 = arith.constant 0 : i32
    return %arg0, %arg1, %arg2 : i32, i32, i32
  }
}

</mosaic_0001>

<bundles_post_ra>
// kernel: tpu_custom_call.1
= control target key start
LH: loop header
LB: loop body
LE: loop exit
PB: predicated region body
PF: predicated region fallthrough
CT: control target
= control target key end

     0   :  { %8 = vsyncpa [#allocation5], 0  ;;  %s506_s0 = inlined_call_operand.hbm [shape: f32[2,8,32], index: 0, kind: input, shape index: {}]   ;;  %s507_s1 = inlined_call_operand.hbm [shape: f32[2,8,32], index: 1, kind: input, shape index: {}]   ;;  %s508_s2 = inlined_call_operand.hbm [shape: f32[3,32], index: 2, kind: input, shape index: {}]   ;;  %s509_s3 = inlined_call_operand.hbm [shape: f32[2,8,8], index: 3, kind: output, shape index: {}]  }
   0x1   :  { %9 = vsyncpa [#allocation8], 0 }
   0x2   :  { %10 = vsyncpa [#allocation6], 0  ;;  %s444_s12 = smov [#allocation7]   ;;  %s445_s14 = smov [#allocation4]  }
   0x3   :  { %s28_s13 = sshll.u32 %s444_s12, 4  ;;  %s16_s15 = sshll.u32 %s445_s14, 4  ;;  %s29_s13 = int_to_ptr.vmem [resolvable:$true] %s28_s13  ;;  %s17_s15 = int_to_ptr.vmem [resolvable:$true] %s16_s15 }
   0x4   :  { %s366_s16 = scalar_lea.vmem %s29_s13, 256  ;;  %p371_p1 = scmp.lt.s32.totalorder %s29_s13, %s29_s13 }
   0x5   :  { %p367_p0 = scmp.ne.s32.totalorder %s29_s13, %s366_s16  ;;  %p372_p2 = scmp.lt.s32.totalorder %s366_s16, %s366_s16 }
   0x7   :  { %p373_p3 = por %p372_p2, %p371_p1 }
   0x9   :  { %p374_p4 = pnand %p373_p3, %p367_p0 }
   0xb   :  { %377 = shalt.err (!%p374_p4)
}
   0xc   :  { %s446_s17 = smov 128   ;;  %s447_s18 = smov 8  }
   0xd   :  { %34 = dma.hbm_to_vmem [thread:$0]  %s507_s1, 256, %s29_s13, [#allocation8], %s446_s17, %s446_s17, %s447_s18  }
   0xe   :  { %s386_s21 = scalar_lea.vmem %s17_s15, 256  ;;  %p391_p6 = scmp.lt.s32.totalorder %s17_s15, %s17_s15 }
   0xf   :  { %p387_p5 = scmp.ne.s32.totalorder %s17_s15, %s386_s21  ;;  %p392_p7 = scmp.lt.s32.totalorder %s386_s21, %s386_s21 }
  0x11   :  { %p393_p8 = por %p392_p7, %p391_p6 }
  0x13   :  { %p394_p9 = pnand %p393_p8, %p387_p5 }
  0x15   :  { %397 = shalt.err (!%p394_p9)
}
  0x16   :  { %22 = dma.hbm_to_vmem [thread:$0]  %s506_s0, 256, %s17_s15, [#allocation5], %s446_s17, %s446_s17, %s447_s18  }
  0x17   :  { %s448_s24 = smov [#allocation9]  }
  0x18   :  { %s41_s25 = sshll.u32 %s448_s24, 4  ;;  %s42_s25 = int_to_ptr.vmem [resolvable:$true] %s41_s25 }
  0x19   :  { %s406_s26 = scalar_lea.vmem %s42_s25, 64  ;;  %p411_p11 = scmp.lt.s32.totalorder %s42_s25, %s42_s25 }
  0x1a   :  { %p407_p10 = scmp.ne.s32.totalorder %s42_s25, %s406_s26  ;;  %p412_p12 = scmp.lt.s32.totalorder %s406_s26, %s406_s26 }
  0x1c   :  { %p413_p13 = por %p412_p12, %p411_p11 }
  0x1e   :  { %p414_p0 = pnand %p413_p13, %p407_p10 }
  0x20   :  { %417 = shalt.err (!%p414_p0)
}
  0x21   :  { %44 = dma.hbm_to_vmem [thread:$0]  %s508_s2, 64, %s42_s25, [#allocation8]  }
  0x22   :  { %438 = dma.done.wait [#allocation5], 256  }
  0x23   :  { %439 = vsyncadd [#allocation5], 4294967040 }
  0x24   :  { %440 = dma.done.wait [#allocation8], 320  }
  0x25   :  { %441 = vsyncadd [#allocation8], 4294966976  ;;  %v61_v0 = vlaneseq  ;;  %v54_v4 = vld [vmem:[#allocation9] sm:$0x7]  ;;  %v60_v6 = vld [vmem:[#allocation4 + $0x8] sm:$0xff]  ;;  %vm67_vm0 = vcmask 261120  }
  0x26   :  { %v59_v5 = vld [vmem:[#allocation4] sm:$0xff]  ;;  %v449_v17 = vmov 0.0   ;;  %v93_v18 = vld [vmem:[#allocation7] sm:$0xff]  ;;  %vm450_vm1 = vmmov 0   ;;  %v94_v19 = vld [vmem:[#allocation7 + $0x8] sm:$0xff]  ;;  %v451_v22 = vmov 0  }
  0x27   :  { %v62_v1 = vshrl.u32 %v61_v0, 7  ;;  %337 = vmatprep.subr.mxu0 %v449_v17  ;;  %342 = vmatprep.subr.mxu1 %v449_v17  ;;  %v277_v21 = vand.u32 127, %v61_v0  ;;  %vm86_vm2 = vcmask 7168   ;;  %vm308_vm3 = vcmask 64512   ;;  %s452_s0 = smov [#allocation10]  }
  0x28   :  { %338 = vmatpush3.xpose.msk.msra.mxu0 %vm67_vm0, %v93_v18  ;;  %339 = vmatprep.mubr.msk.f32.mxu0 %vm450_vm1, %v449_v17  ;;  %s316_s2 = sshll.u32 %s452_s0, 4  ;;  %s317_s2 = int_to_ptr.vmem [resolvable:$true] %s316_s2 }
  0x29   :  { %v63_v2 = vsub.s32 0, %v62_v1  ;;  %v76_v3 = vsub.s32 1, %v62_v1  ;;  %344 = vmatprep.mubr.msk.f32.mxu1 %vm450_vm1, %v449_v17  ;;  %343 = vmatpush3.xpose.msk.msra.mxu1 %vm67_vm0, %v94_v19  ;;  %v97_v20 = vsub.s32 2, %v62_v1  ;;  %v280_v24 = vsub.s32 %v277_v21, %v62_v1  ;;  %s418_s28 = scalar_lea.vmem %s317_s2, 256  ;;  %p423_p2 = scmp.lt.s32.totalorder %s317_s2, %s317_s2 }
  0x2a   :  { %356 = vset.pattern.permute.xlu0 %v451_v22  ;;  %357 = vset.pattern.permute.xlu1 %v451_v22  ;;  %p419_p1 = scmp.ne.s32.totalorder %s317_s2, %s418_s28  ;;  %p424_p3 = scmp.lt.s32.totalorder %s418_s28, %s418_s28 }
  0x2b   :  { %v64_v7 = vrot.slane %v54_v4, %v63_v2  ;;  %v77_v8 = vrot.slane %v54_v4, %v76_v3  ;;  %v98_v23 = vrot.slane %v54_v4, %v97_v20 }
  0x2c   :  { %p425_p4 = por %p424_p3, %p423_p2 }
  0x2d   :  { %v65_v9 = vmul.f32 %v64_v7, %v59_v5  ;;  %v66_v10 = vmul.f32 %v64_v7, %v60_v6  ;;  %v78_v11 = vmul.f32 %v77_v8, %v59_v5  ;;  %v79_v12 = vmul.f32 %v77_v8, %v60_v6 }
  0x2e   :  { %v99_v25 = vmul.f32 %v98_v23, %v93_v18  ;;  %v100_v26 = vmul.f32 %v98_v23, %v94_v19  ;;  %p426_p5 = pnand %p425_p4, %p419_p1 }
  0x2f   :  { %v68_v13 = vsel %vm67_vm0, %v65_v9, 0.0  ;;  %v80_v14 = vsel %vm67_vm0, %v78_v11, 0.0  ;;  %v71_v15 = vsel %vm67_vm0, %v66_v10, 0.0  ;;  %v83_v16 = vsel %vm67_vm0, %v79_v12, 0.0 }
  0x30   :  { %69 = vadd.xlane.f32.xlu0 %v68_v13  ;;  %81 = vadd.xlane.f32.xlu1 %v80_v14  ;;  %v102_v27 = vsel %vm67_vm0, %v99_v25, 0.0  ;;  %v105_v28 = vsel %vm67_vm0, %v100_v26, 0.0 }
  0x34   :  { %72 = vadd.xlane.f32.xlu0 %v71_v15  ;;  %84 = vadd.xlane.f32.xlu1 %v83_v16 }
  0x38   :  { %103 = vadd.xlane.f32.xlu0 %v102_v27  ;;  %106 = vadd.xlane.f32.xlu1 %v105_v28 }
  0xb9   :  { %v70_v29 = vpop.xlane.xlu0 %69  ;;  %v82_v30 = vpop.xlane.xlu1 %81 }
  0xba   :  { %v89_v31 = vmul.f32 %v70_v29, %v59_v5  ;;  %87 = vst.msk [vmem:[#allocation3] sm:$0xff] %vm86_vm2, %v82_v30 }
  0xbc   :  { %91 = vst.msk [vmem:[#allocation2] sm:$0xff] %vm67_vm0, %v89_v31 }
  0xbd   :  { %v73_v32 = vpop.xlane.xlu0 %72  ;;  %v85_v33 = vpop.xlane.xlu1 %84 }
  0xbe   :  { %v90_v34 = vmul.f32 %v73_v32, %v60_v6  ;;  %88 = vst.msk [vmem:[#allocation3 + $0x8] sm:$0xff] %vm86_vm2, %v85_v33 }
  0xc0   :  { %92 = vst.msk [vmem:[#allocation2 + $0x8] sm:$0xff] %vm67_vm0, %v90_v34 }
  0xc1   :  { %v110_v35 = vld [vmem:[#allocation3] sm:$0xff]  ;;  %v104_v39 = vpop.xlane.xlu0 %103  ;;  %v107_v40 = vpop.xlane.xlu1 %106 }
  0xc2   :  { %114 = vperm.xlu0 %356, %v110_v35   ;;  %v281_v43 = vrot.slane %v104_v39, %v280_v24  ;;  %v285_v49 = vrot.slane %v107_v40, %v280_v24 }
  0xc3   :  { %v108_v36 = vld [vmem:[#allocation2] sm:$0xff] }
  0xc4   :  { %340 = vmatmul.mubr.msk.f32.vlgmr.msra.gmra.mxu0 %vm67_vm0, %v108_v36 }
  0xc5   :  { %v111_v37 = vld [vmem:[#allocation3 + $0x8] sm:$0xff] }
  0xc6   :  { %119 = vperm.xlu1 %357, %v111_v37  }
  0xc7   :  { %v109_v38 = vld [vmem:[#allocation2 + $0x8] sm:$0xff] }
  0xc8   :  { %345 = vmatmul.mubr.msk.f32.vlgmr.msra.gmra.mxu1 %vm67_vm0, %v109_v38 }
 0x13d   :  { %v115_v41 = vpop.permute.xlu0 %114 }
 0x141   :  { %v120_v46 = vpop.permute.xlu1 %119 }
 0x184   :  { %v194_v42 = vpop.f32.mrf.mxu0 }
 0x185   :  { %v195_v44 = vadd.f32 %v194_v42, %v115_v41 }
 0x186   :  { %v341_v45 = vpop.f32.mrf.mxu0 }
 0x187   :  { %v306_v47 = vadd.f32 %v281_v43, %v195_v44 }
 0x188   :  { %v270_v48 = vpop.f32.mrf.mxu1 }
 0x189   :  { %v271_v50 = vadd.f32 %v270_v48, %v120_v46  ;;  %309 = vst.msk [vmem:[#allocation10] sm:$0xff] %vm308_vm3, %v306_v47 }
 0x18a   :  { %v346_v51 = vpop.f32.mrf.mxu1 }
 0x18b   :  { %v307_v52 = vadd.f32 %v285_v49, %v271_v50 }
 0x18d   :  { %310 = vst.msk [vmem:[#allocation10 + $0x8] sm:$0xff] %vm308_vm3, %v307_v52 }
 0x18e   :  { %429 = shalt.err (!%p426_p5)
}
 0x18f   :  { %322 = dma.vmem_to_hbm [thread:$0]  %s317_s2, 256, %s509_s3, [#allocation6], %s446_s17, %s446_s17, %s447_s18  }
 0x190   :  { %442 = dma.done.wait [#allocation6], 256  }
 0x191   :  { %443 = vsyncadd [#allocation6], 4294967040 }
 0x192   :  { %326 = vsyncpa [#allocation5], 1 }
 0x193   :  { %327 = vsyncpa [#allocation8], 1 }
 0x194   :  { %328 = vsyncpa [#allocation6], 1 }

</bundles_post_ra>
